<compile_context>
chip_gen: v7x
topology: tpu7x:2x2x1
jax: 0.10.0
libtpu: 0.0.40
codegen_flags: <defaults>
</compile_context>

<pallas_src>
import jax
import jax.numpy as jnp
from jax.experimental import pallas as pl
from jax.experimental.pallas import tpu as pltpu


# -----------------------------------------------------------------------------
# Fast path: identity lookup == lane-dense copy of the embedding table.
# -----------------------------------------------------------------------------
def _copy_kernel(x_ref, o_ref):
    o_ref[...] = x_ref[...]


def _pick_row_tile(rows, target=512):
    """Largest multiple-of-8 tile <= target that evenly divides `rows`;
    falls back to whole-array residency for small/odd sizes."""
    if rows <= target:
        return rows
    for t in range(target, 7, -8):
        if rows % t == 0:
            return t
    return rows


def _identity_lookup(embedding_weight):
    L, H = embedding_weight.shape
    total = L * H
    if total % 128 == 0:
        # Lane-dense view: last dim exactly 128 -> unmasked full-lane stores.
        rows = total // 128
        x2d = embedding_weight.reshape(rows, 128)
    else:
        # Odd hidden sizes: straight (L, H) copy (still correct, just not lane-dense).
        rows = L
        x2d = embedding_weight

    tile = _pick_row_tile(rows)
    grid = (rows // tile,)
    cols = x2d.shape[1]

    out2d = pl.pallas_call(
        _copy_kernel,
        out_shape=jax.ShapeDtypeStruct(x2d.shape, x2d.dtype),
        grid_spec=pltpu.PrefetchScalarGridSpec(
            num_scalar_prefetch=0,
            grid=grid,
            in_specs=[pl.BlockSpec((tile, cols), lambda i: (i, 0))],
            out_specs=pl.BlockSpec((tile, cols), lambda i: (i, 0)),
        ),
        compiler_params=pltpu.CompilerParams(
            dimension_semantics=("parallel",),
        ),
    )(x2d)
    return out2d.reshape(L, H)


# -----------------------------------------------------------------------------
# General fallback: scalar-prefetched row gather (arbitrary indices).
# Indices live in SMEM (scalar prefetch) and are consumed only by the
# index_map; the kernel body is a single already-gathered-row copy.
# -----------------------------------------------------------------------------
def _gather_kernel(ids_ref, row_ref, o_ref):
    del ids_ref  # used by the index_maps, not by the body
    o_ref[...] = row_ref[...]


def _gather_lookup(seq_indices, embedding_weight):
    n_rows, H = embedding_weight.shape
    L = seq_indices.shape[0]
    # Present rows as (n_rows, 1, H) so each block's last two dims equal the
    # full array dims (clean TPU layout for a 1-row block).
    emb3 = embedding_weight.reshape(n_rows, 1, H)

    out3 = pl.pallas_call(
        _gather_kernel,
        out_shape=jax.ShapeDtypeStruct((L, 1, H), embedding_weight.dtype),
        grid_spec=pltpu.PrefetchScalarGridSpec(
            num_scalar_prefetch=1,
            grid=(L,),
            in_specs=[pl.BlockSpec((1, 1, H), lambda i, ids: (ids[i], 0, 0))],
            out_specs=pl.BlockSpec((1, 1, H), lambda i, ids: (i, 0, 0)),
        ),
        compiler_params=pltpu.CompilerParams(
            dimension_semantics=("arbitrary",),
        ),
    )(seq_indices.astype(jnp.int32), emb3)
    return out3.reshape(L, H)


# -----------------------------------------------------------------------------
# Wrapper: equivalent of PromptEncoder.forward()
# -----------------------------------------------------------------------------
def prompt_encoder_forward(seq_indices, embedding_weight):
    n_rows, _ = embedding_weight.shape
    L = seq_indices.shape[0]
    try:
        is_identity = (L == n_rows) and bool(
            jnp.all(seq_indices.astype(jnp.int32) == jnp.arange(L, dtype=jnp.int32))
        )
    except Exception:
        # Traced / abstract indices: take the general gather path.
        is_identity = False

    if is_identity:
        # The module's actual forward: seq_indices == arange -> identity copy.
        return _identity_lookup(embedding_weight)
    return _gather_lookup(seq_indices, embedding_weight)


if __name__ == "__main__":
    # Mirror the PyTorch __init__:
    #   template = (3, 3, 2) -> spell_length = 8 ; hidden_size = 32
    template = (3, 3, 2)
    spell_length = sum(template)          # len(cloze_mask[0]) == 8
    hidden_size = 32

    key = jax.random.PRNGKey(0)
    # nn.Embedding default init: weight ~ N(0, 1)
    embedding_weight = jax.random.normal(
        key, (spell_length, hidden_size), dtype=jnp.float32
    )
    seq_indices = jnp.arange(spell_length, dtype=jnp.int32)

    # Module forward (fast lane-dense copy path).
    out = prompt_encoder_forward(seq_indices, embedding_weight)
    out = jax.block_until_ready(out)
    ref = embedding_weight[seq_indices]
    assert out.shape == (spell_length, hidden_size)
    assert jnp.array_equal(out, ref), "identity-path mismatch vs reference gather"

    # Also exercise the general scalar-prefetch gather path (non-arange indices).
    perm = seq_indices[::-1]
    out2 = jax.block_until_ready(prompt_encoder_forward(perm, embedding_weight))
    assert jnp.array_equal(out2, embedding_weight[perm]), "gather-path mismatch"

    print("KERNEL_OK")
</pallas_src>

<mosaic_0001>
module attributes {stable_mosaic.version = 11 : i64} {
  func.func @_copy_kernel(%arg0: i32, %arg1: memref<2x128xf32, #tpu.memory_space<vmem>>, %arg2: memref<2x128xf32, #tpu.memory_space<vmem>>) attributes {dimension_semantics = [#tpu.dimension_semantics<parallel>], iteration_bounds = array<i64: 1>, scalar_prefetch = 0 : i64, scratch_operands = 0 : i64, tpu.core_type = #tpu.core_type<tc>, window_params = [{transform_indices = @transform_0, window_bounds = array<i64: 2, 128>}, {transform_indices = @transform_1, window_bounds = array<i64: 2, 128>}]} {
    %c0 = arith.constant 0 : index
    %c0_0 = arith.constant 0 : index
    %0 = vector.load %arg1[%c0, %c0_0] : memref<2x128xf32, #tpu.memory_space<vmem>>, vector<2x128xf32>
    %c0_1 = arith.constant 0 : index
    %c0_2 = arith.constant 0 : index
    %1 = vector.load %arg2[%c0_1, %c0_2] : memref<2x128xf32, #tpu.memory_space<vmem>>, vector<2x128xf32>
    tpu.vector_store %arg2[%c0_1, %c0_2], %0 {strides = array<i32>} : memref<2x128xf32, #tpu.memory_space<vmem>>, vector<2x128xf32>,
    return
  }
  func.func @transform_0(%arg0: i32) -> (i32, i32) {
    %c0_i32 = arith.constant 0 : i32
    %c0_i32_0 = arith.constant 0 : i32
    return %arg0, %c0_i32 : i32, i32
  }
  func.func @transform_1(%arg0: i32) -> (i32, i32) {
    %c0_i32 = arith.constant 0 : i32
    %c0_i32_0 = arith.constant 0 : i32
    return %arg0, %c0_i32 : i32, i32
  }
}

</mosaic_0001>

<bundles_post_ra>
// kernel: tpu_custom_call.1
= control target key start
LH: loop header
LB: loop body
LE: loop exit
PB: predicated region body
PF: predicated region fallthrough
CT: control target
= control target key end

     0   :  { %6 = vsyncpa [#allocation3], 0  ;;  %s124_s0 = inlined_call_operand.hbm [shape: f32[2,128], index: 0, kind: input, shape index: {}]   ;;  %s125_s1 = inlined_call_operand.hbm [shape: f32[2,128], index: 1, kind: output, shape index: {}]  }
   0x1   :  { %7 = vsyncpa [#allocation4], 0  ;;  %s88_s6 = smov [#allocation2]   ;;  %s40_s10 = scalar_lea.hbm %s124_s0, 32 }
   0x2   :  { %s14_s7 = sshll.u32 %s88_s6, 4  ;;  %p41_p0 = scmp.ne.s32.totalorder %s124_s0, %s40_s10  ;;  %s15_s7 = int_to_ptr.vmem [resolvable:$true] %s14_s7 }
   0x3   :  { %p44_p1 = scmp.lt.u32.totalorder %s40_s10, %s124_s0 }
   0x5   :  { %p46_p2 = pnand %p44_p1, %p41_p0 }
   0x7   :  { %49 = shalt.err (!%p46_p2)
}
   0x8   :  { %s50_s15 = scalar_lea.vmem %s15_s7, 32  ;;  %p55_p4 = scmp.lt.s32.totalorder %s15_s7, %s15_s7 }
   0x9   :  { %p51_p3 = scmp.ne.s32.totalorder %s15_s7, %s50_s15  ;;  %p56_p5 = scmp.lt.s32.totalorder %s50_s15, %s50_s15 }
   0xb   :  { %p57_p6 = por %p56_p5, %p55_p4 }
   0xd   :  { %p58_p7 = pnand %p57_p6, %p51_p3 }
   0xf   :  { %61 = shalt.err (!%p58_p7)
}
  0x10   :  { %17 = dma.hbm_to_vmem [thread:$0]  %s124_s0, 32, %s15_s7, [#allocation3]  }
  0x11   :  { %84 = dma.done.wait [#allocation3], 32  }
  0x12   :  { %85 = vsyncadd [#allocation3], 4294967264  ;;  %s89_s18 = smov [#allocation5]   ;;  %v21_v0 = vld [vmem:[#allocation2] sm:$0x3] }
  0x13   :  { %s29_s19 = sshll.u32 %s89_s18, 4  ;;  %22 = vst [vmem:[#allocation5] sm:$0x3] %v21_v0  ;;  %s30_s19 = int_to_ptr.vmem [resolvable:$true] %s29_s19 }
  0x14   :  { %s62_s20 = scalar_lea.vmem %s30_s19, 32  ;;  %p67_p9 = scmp.lt.s32.totalorder %s30_s19, %s30_s19 }
  0x15   :  { %p63_p8 = scmp.ne.s32.totalorder %s30_s19, %s62_s20  ;;  %p68_p10 = scmp.lt.s32.totalorder %s62_s20, %s62_s20 }
  0x17   :  { %p69_p11 = por %p68_p10, %p67_p9 }
  0x19   :  { %p70_p12 = pnand %p69_p11, %p63_p8 }
  0x1b   :  { %73 = shalt.err (!%p70_p12)
}
  0x1c   :  { %s74_s23 = scalar_lea.hbm %s125_s1, 32 }
  0x1d   :  { %p75_p13 = scmp.ne.s32.totalorder %s125_s1, %s74_s23  ;;  %p78_p0 = scmp.lt.u32.totalorder %s74_s23, %s125_s1 }
  0x1f   :  { %p80_p1 = pnand %p78_p0, %p75_p13 }
  0x21   :  { %83 = shalt.err (!%p80_p1)
}
  0x22   :  { %32 = dma.vmem_to_hbm [thread:$0]  %s30_s19, 32, %s125_s1, [#allocation4]  }
  0x23   :  { %86 = dma.done.wait [#allocation4], 32  }
  0x24   :  { %87 = vsyncadd [#allocation4], 4294967264 }
  0x25   :  { %36 = vsyncpa [#allocation3], 1 }
  0x26   :  { %37 = vsyncpa [#allocation4], 1 }

</bundles_post_ra>
